<compile_context>
chip_gen: v5e
topology: v5e:2x2
jax: 0.10.0
libtpu: 0.0.40
codegen_flags: <defaults>
</compile_context>

<pallas_src>
import math
import jax
import jax.numpy as jnp
from jax.experimental import pallas as pl
from jax.experimental.pallas import tpu as pltpu

_SUBLANE = 8          # row (second-to-last) block dim granule
_MAX_ROW_TILE = 4096  # ~3 MiB double-buffered VMEM @ S=32, L=64 f32 -> fits all gens


def _round_up(n, m):
    return ((n + m - 1) // m) * m


def _dual_tensorcore():
    """True on parts with 2 TensorCores per chip (v7x). Used only to shape the
    grid so the 'parallel' row axis actually feeds both cores; v5e/v6e have a
    single TC so fewer, larger steps are strictly better there."""
    try:
        kind = jax.devices()[0].device_kind.lower()
    except Exception:
        return False
    return ("v7" in kind) or ("7x" in kind)


def _select_row_tile(batch):
    """Pick the row tile: minimum step count that fits VMEM; on dual-TC chips
    split into (at least) two balanced steps when the batch is big enough."""
    if batch <= _MAX_ROW_TILE:
        if _dual_tensorcore() and batch >= 2 * _SUBLANE:
            # Two balanced steps; tile is a multiple of 8, last block may be
            # partial (Pallas masks the out-of-range rows on load/store).
            return _round_up(pl.cdiv(batch, 2), _SUBLANE)
        # Single step covering the whole batch. A row block equal to the full
        # row dim is legal even when batch is not a multiple of 8.
        return batch
    return _MAX_ROW_TILE


def qvn_head_relu_kernel(x_ref, w_ref, b_ref, o_ref):
    # One MXU matmul per row tile + VPU bias-add/ReLU; weight/bias VMEM-resident.
    y = jnp.dot(x_ref[...], w_ref[...], preferred_element_type=jnp.float32)
    o_ref[...] = jnp.maximum(y + b_ref[...], 0.0).astype(o_ref.dtype)


def qvn_forward(x, w_t, b, *, out_dtype=jnp.float32):
    """x: (B, S) f32; w_t: (S, L) f32 (transposed PyTorch weight); b: (1, L) f32.
    Returns relu(x @ W.T + b): (B, L) in `out_dtype` (f32 by default)."""
    B, S = x.shape
    L = w_t.shape[1]

    row_tile = _select_row_tile(B)
    num_tiles = pl.cdiv(B, row_tile)

    flops = 2 * B * S * L
    bytes_accessed = (4 * (B * S + S * L + L)
                      + jnp.dtype(out_dtype).itemsize * B * L)

    return pl.pallas_call(
        qvn_head_relu_kernel,
        out_shape=jax.ShapeDtypeStruct((B, L), out_dtype),
        grid=(num_tiles,),
        in_specs=[
            # Row tile of activations marches with the grid. NOTE: the S (=32)
            # block dim is only legal because it equals the full array dim; if
            # S is ever tiled it must be a multiple of 128.
            pl.BlockSpec((row_tile, S), lambda i: (i, 0)),
            # Weight / bias: same block every step -> DMA'd once, VMEM-resident.
            # L (=64) block dims are legal because they equal the full dim.
            pl.BlockSpec((S, L), lambda i: (0, 0)),
            pl.BlockSpec((1, L), lambda i: (0, 0)),
        ],
        out_specs=pl.BlockSpec((row_tile, L), lambda i: (i, 0)),
        compiler_params=pltpu.CompilerParams(
            dimension_semantics=("parallel",),
        ),
        cost_estimate=pl.CostEstimate(
            flops=flops, transcendentals=0, bytes_accessed=bytes_accessed),
    )(x, w_t, b)


def make_qvn_params(key, state_size, layer_size):
    """Mirrors weight_init([head]): kaiming_normal_ (fan_in, relu gain) weight,
    zero bias. Weight is stored pre-transposed as (state_size, layer_size) and
    bias as (1, layer_size) so nothing is reshaped/padded per call."""
    std = math.sqrt(2.0 / state_size)
    w = jax.random.normal(key, (layer_size, state_size), dtype=jnp.float32) * std
    return w.T, jnp.zeros((1, layer_size), dtype=jnp.float32)


if __name__ == "__main__":
    # Shapes consistent with QVN: state_size=32, layer_size=64, batch of 512
    # state rows. Single-TC chips run this as one grid step; v7x as two.
    batch, state_size, layer_size = 512, 32, 64
    key = jax.random.PRNGKey(0)
    k_x, k_w = jax.random.split(key)

    x = jax.random.normal(k_x, (batch, state_size), dtype=jnp.float32)
    w_t, b = make_qvn_params(k_w, state_size, layer_size)

    fwd = jax.jit(qvn_forward)
    out = fwd(x, w_t, b)
    jax.block_until_ready(out)

    # Reference in plain JAX.
    ref = jnp.maximum(x @ w_t + b, 0.0)
    assert out.shape == (batch, layer_size)
    assert jnp.allclose(out, ref, atol=1e-5, rtol=1e-5)

    # Small-batch (RL single-state style) path: no padding to a fixed tile.
    x_small = x[:5]
    out_small = jax.jit(qvn_forward)(x_small, w_t, b)
    jax.block_until_ready(out_small)
    ref_small = jnp.maximum(x_small @ w_t + b, 0.0)
    assert out_small.shape == (5, layer_size)
    assert jnp.allclose(out_small, ref_small, atol=1e-5, rtol=1e-5)

    # TODO(synk): get_quantiles / calc_cos / NoisyLinear stochastic path are not
    # part of QVN.forward(); not kernelized.
    print("KERNEL_OK")
</pallas_src>

<mosaic_0001>
module attributes {stable_mosaic.version = 11 : i64} {
  func.func @qvn_head_relu_kernel(%arg0: i32, %arg1: memref<512x32xf32, #tpu.memory_space<vmem>>, %arg2: memref<32x64xf32, #tpu.memory_space<vmem>>, %arg3: memref<1x64xf32, #tpu.memory_space<vmem>>, %arg4: memref<512x64xf32, #tpu.memory_space<vmem>>) attributes {dimension_semantics = [#tpu.dimension_semantics<parallel>], iteration_bounds = array<i64: 1>, scalar_prefetch = 0 : i64, scratch_operands = 0 : i64, tpu.core_type = #tpu.core_type<tc>, window_params = [{transform_indices = @transform_0, window_bounds = array<i64: 512, 32>}, {pipeline_mode = #tpu.pipeline_mode<synchronous>, transform_indices = @transform_1, window_bounds = array<i64: 32, 64>}, {pipeline_mode = #tpu.pipeline_mode<synchronous>, transform_indices = @transform_2, window_bounds = array<i64: 1, 64>}, {transform_indices = @transform_3, window_bounds = array<i64: 512, 64>}]} {
    %c0 = arith.constant 0 : index
    %c0_0 = arith.constant 0 : index
    %0 = vector.load %arg1[%c0, %c0_0] : memref<512x32xf32, #tpu.memory_space<vmem>>, vector<512x32xf32>
    %c0_1 = arith.constant 0 : index
    %c0_2 = arith.constant 0 : index
    %1 = vector.load %arg2[%c0_1, %c0_2] : memref<32x64xf32, #tpu.memory_space<vmem>>, vector<32x64xf32>
    %cst = arith.constant dense<0.000000e+00> : vector<512x64xf32>
    %2 = tpu.matmul %0, %1, %cst {dimension_numbers = #tpu.dot_dimension_numbers<[1], [0], [0], [1], [0, 0, 1, 1], [], []>} : vector<512x32xf32>, vector<32x64xf32>, vector<512x64xf32> -> vector<512x64xf32>
    %c0_3 = arith.constant 0 : index
    %c0_4 = arith.constant 0 : index
    %3 = vector.load %arg3[%c0_3, %c0_4] : memref<1x64xf32, #tpu.memory_space<vmem>>, vector<1x64xf32>
    %4 = vector.broadcast %3 : vector<1x64xf32> to vector<512x64xf32>
    %5 = arith.addf %2, %4 : vector<512x64xf32>
    %cst_5 = arith.constant 0.000000e+00 : f32
    %6 = vector.broadcast %cst_5 : f32 to vector<512x64xf32>
    %7 = arith.maximumf %5, %6 : vector<512x64xf32>
    %c0_6 = arith.constant 0 : index
    %c0_7 = arith.constant 0 : index
    %8 = vector.load %arg4[%c0_6, %c0_7] : memref<512x64xf32, #tpu.memory_space<vmem>>, vector<512x64xf32>
    tpu.vector_store %arg4[%c0_6, %c0_7], %7 {strides = array<i32>} : memref<512x64xf32, #tpu.memory_space<vmem>>, vector<512x64xf32>,
    return
  }
  func.func @transform_0(%arg0: i32) -> (i32, i32) {
    %c0_i32 = arith.constant 0 : i32
    %c0_i32_0 = arith.constant 0 : i32
    return %arg0, %c0_i32 : i32, i32
  }
  func.func @transform_1(%arg0: i32) -> (i32, i32) {
    %c0_i32 = arith.constant 0 : i32
    %c0_i32_0 = arith.constant 0 : i32
    %c0_i32_1 = arith.constant 0 : i32
    return %c0_i32, %c0_i32_0 : i32, i32
  }
  func.func @transform_2(%arg0: i32) -> (i32, i32) {
    %c0_i32 = arith.constant 0 : i32
    %c0_i32_0 = arith.constant 0 : i32
    %c0_i32_1 = arith.constant 0 : i32
    return %c0_i32, %c0_i32_0 : i32, i32
  }
  func.func @transform_3(%arg0: i32) -> (i32, i32) {
    %c0_i32 = arith.constant 0 : i32
    %c0_i32_0 = arith.constant 0 : i32
    return %arg0, %c0_i32 : i32, i32
  }
}

</mosaic_0001>

<bundles_post_ra>
// kernel: qvn_forward.1
= control target key start
LH: loop header
LB: loop body
LE: loop exit
PB: predicated region body
PF: predicated region fallthrough
CT: control target
= control target key end

     0   :  { %vm86_vm0 = vcmask 261120   ;;  %vm552_vm1 = vcmask 523264   ;;  %s1311_s1 = inlined_call_operand.vmem [shape: f32[32,64], index: 1, kind: input, shape index: {}]   ;;  %s1312_s0 = inlined_call_operand.vmem [shape: f32[512,32], index: 0, kind: input, shape index: {}]   ;;  %s1313_s2 = inlined_call_operand.vmem [shape: f32[1,64], index: 2, kind: input, shape index: {}]   ;;  %s1314_s3 = inlined_call_operand.vmem [shape: f32[512,64], index: 3, kind: output, shape index: {}]  }
   0x1   :  { %v81_v0 = vld [vmem:[%s1311_s1 + $0x18] sm:$0xff]  ;;  %v80_v1 = vld [vmem:[%s1311_s1 + $0x10] sm:$0xff]  ;;  %v79_v2 = vld [vmem:[%s1311_s1 + $0x8] sm:$0xff] }
   0x2   :  { %686 = vmatpush.msra.mxu2 %v81_v0  ;;  %687 = vmatpush.msra.mxu3 %v81_v0  ;;  %v78_v3 = vld [vmem:[%s1311_s1] sm:$0xff]  ;;  %v47_v8 = vld [vmem:[%s1312_s0 + $0x108] sm:$0xff]  ;;  %v48_v12 = vld [vmem:[%s1312_s0 + $0x110] sm:$0xff] }
   0x3   :  { %291 = vmatpush.msra.mxu0 %v81_v0  ;;  %685 = vmatpush.msra.mxu1 %v81_v0  ;;  %v46_v4 = vld [vmem:[%s1312_s0 + $0x100] sm:$0xff]  ;;  %v63_v9 = vld [vmem:[%s1312_s0 + $0x188] sm:$0xff]  ;;  %v64_v13 = vld [vmem:[%s1312_s0 + $0x190] sm:$0xff] }
   0x4   :  { %689 = vmatpush.msra.mxu2 %v80_v1  ;;  %690 = vmatpush.msra.mxu3 %v80_v1  ;;  %v62_v5 = vld [vmem:[%s1312_s0 + $0x180] sm:$0xff]  ;;  %v15_v10 = vld [vmem:[%s1312_s0 + $0x8] sm:$0xff]  ;;  %v16_v14 = vld [vmem:[%s1312_s0 + $0x10] sm:$0xff] }
   0x5   :  { %292 = vmatpush.msra.mxu0 %v80_v1  ;;  %688 = vmatpush.msra.mxu1 %v80_v1  ;;  %v14_v6 = vld [vmem:[%s1312_s0] sm:$0xff]  ;;  %v31_v11 = vld [vmem:[%s1312_s0 + $0x88] sm:$0xff]  ;;  %v32_v15 = vld [vmem:[%s1312_s0 + $0x90] sm:$0xff] }
   0x6   :  { %692 = vmatpush.msra.mxu2 %v79_v2  ;;  %693 = vmatpush.msra.mxu3 %v79_v2  ;;  %v30_v7 = vld [vmem:[%s1312_s0 + $0x80] sm:$0xff]  ;;  %v49_v16 = vld [vmem:[%s1312_s0 + $0x118] sm:$0xff]  ;;  %v51_v24 = vld [vmem:[%s1312_s0 + $0x128] sm:$0xff] }
   0x7   :  { %293 = vmatpush.msra.mxu0 %v79_v2  ;;  %691 = vmatpush.msra.mxu1 %v79_v2  ;;  %v65_v17 = vld [vmem:[%s1312_s0 + $0x198] sm:$0xff]  ;;  %v50_v20 = vld [vmem:[%s1312_s0 + $0x120] sm:$0xff]  ;;  %v67_v25 = vld [vmem:[%s1312_s0 + $0x1a8] sm:$0xff] }
   0x8   :  { %695 = vmatpush.msra.mxu2 %v78_v3  ;;  %696 = vmatpush.msra.mxu3 %v78_v3  ;;  %v17_v18 = vld [vmem:[%s1312_s0 + $0x18] sm:$0xff]  ;;  %v66_v21 = vld [vmem:[%s1312_s0 + $0x1a0] sm:$0xff]  ;;  %v19_v26 = vld [vmem:[%s1312_s0 + $0x28] sm:$0xff] }
   0x9   :  { %653 = vmatmul.msk.f32.vlgmr.msra.gmra.mxu2 %vm86_vm0, %v46_v4  ;;  %669 = vmatmul.msk.f32.vlgmr.msra.gmra.mxu3 %vm86_vm0, %v62_v5  ;;  %v33_v19 = vld [vmem:[%s1312_s0 + $0x98] sm:$0xff]  ;;  %v18_v22 = vld [vmem:[%s1312_s0 + $0x20] sm:$0xff]  ;;  %v35_v27 = vld [vmem:[%s1312_s0 + $0xa8] sm:$0xff] }
   0xa   :  { %294 = vmatpush.msra.mxu0 %v78_v3  ;;  %694 = vmatpush.msra.mxu1 %v78_v3  ;;  %v34_v23 = vld [vmem:[%s1312_s0 + $0xa0] sm:$0xff]  ;;  %v52_v28 = vld [vmem:[%s1312_s0 + $0x130] sm:$0xff]  ;;  %v53_v32 = vld [vmem:[%s1312_s0 + $0x138] sm:$0xff] }
   0xb   :  { %621 = vmatmul.msk.f32.vlgmr.msra.gmra.mxu0 %vm86_vm0, %v14_v6  ;;  %637 = vmatmul.msk.f32.vlgmr.msra.gmra.mxu1 %vm86_vm0, %v30_v7  ;;  %v68_v29 = vld [vmem:[%s1312_s0 + $0x1b0] sm:$0xff]  ;;  %v69_v33 = vld [vmem:[%s1312_s0 + $0x1b8] sm:$0xff]  ;;  %v54_v36 = vld [vmem:[%s1312_s0 + $0x140] sm:$0xff] }
   0xc   :  { %v20_v30 = vld [vmem:[%s1312_s0 + $0x30] sm:$0xff]  ;;  %v21_v34 = vld [vmem:[%s1312_s0 + $0x38] sm:$0xff]  ;;  %v70_v37 = vld [vmem:[%s1312_s0 + $0x1c0] sm:$0xff] }
   0xd   :  { %v36_v31 = vld [vmem:[%s1312_s0 + $0xb0] sm:$0xff]  ;;  %v37_v35 = vld [vmem:[%s1312_s0 + $0xb8] sm:$0xff]  ;;  %v22_v38 = vld [vmem:[%s1312_s0 + $0x40] sm:$0xff] }
   0xe   :  { %v38_v39 = vld [vmem:[%s1312_s0 + $0xc0] sm:$0xff]  ;;  %v55_v40 = vld [vmem:[%s1312_s0 + $0x148] sm:$0xff]  ;;  %v56_v44 = vld [vmem:[%s1312_s0 + $0x150] sm:$0xff] }
   0xf   :  { %v71_v41 = vld [vmem:[%s1312_s0 + $0x1c8] sm:$0xff]  ;;  %v72_v45 = vld [vmem:[%s1312_s0 + $0x1d0] sm:$0xff]  ;;  %v57_v48 = vld [vmem:[%s1312_s0 + $0x158] sm:$0xff] }
  0x10   :  { %v23_v42 = vld [vmem:[%s1312_s0 + $0x48] sm:$0xff]  ;;  %v24_v46 = vld [vmem:[%s1312_s0 + $0x50] sm:$0xff]  ;;  %v73_v49 = vld [vmem:[%s1312_s0 + $0x1d8] sm:$0xff] }
  0x11   :  { %654 = vmatmul.msk.f32.gmra.mxu2 %vm86_vm0, %v47_v8  ;;  %670 = vmatmul.msk.f32.gmra.mxu3 %vm86_vm0, %v63_v9  ;;  %v39_v43 = vld [vmem:[%s1312_s0 + $0xc8] sm:$0xff]  ;;  %v40_v47 = vld [vmem:[%s1312_s0 + $0xd0] sm:$0xff]  ;;  %v25_v50 = vld [vmem:[%s1312_s0 + $0x58] sm:$0xff] }
  0x12   :  { %v41_v51 = vld [vmem:[%s1312_s0 + $0xd8] sm:$0xff]  ;;  %v58_v52 = vld [vmem:[%s1312_s0 + $0x160] sm:$0xff]  ;;  %v59_v56 = vld [vmem:[%s1312_s0 + $0x168] sm:$0xff] }
  0x13   :  { %622 = vmatmul.msk.f32.gmra.mxu0 %vm86_vm0, %v15_v10  ;;  %638 = vmatmul.msk.f32.gmra.mxu1 %vm86_vm0, %v31_v11  ;;  %v74_v53 = vld [vmem:[%s1312_s0 + $0x1e0] sm:$0xff]  ;;  %v75_v57 = vld [vmem:[%s1312_s0 + $0x1e8] sm:$0xff]  ;;  %v60_v60 = vld [vmem:[%s1312_s0 + $0x170] sm:$0xff] }
  0x14   :  { %v26_v54 = vld [vmem:[%s1312_s0 + $0x60] sm:$0xff]  ;;  %v27_v58 = vld [vmem:[%s1312_s0 + $0x68] sm:$0xff]  ;;  %v76_v61 = vld [vmem:[%s1312_s0 + $0x1f0] sm:$0xff] }
  0x15   :  { %v42_v55 = vld [vmem:[%s1312_s0 + $0xe0] sm:$0xff]  ;;  %v43_v59 = vld [vmem:[%s1312_s0 + $0xe8] sm:$0xff]  ;;  %v28_v62 = vld [vmem:[%s1312_s0 + $0x70] sm:$0xff] }
  0x16   :  { %v44_v63 = vld [vmem:[%s1312_s0 + $0xf0] sm:$0xff]  ;;  %v61_v0 = vld [vmem:[%s1312_s0 + $0x178] sm:$0xff]  ;;  %v989_v4 = vld [vmem:[%s1313_s2] ss:$0 sm:$0xff] }
  0x17   :  { %v77_v1 = vld [vmem:[%s1312_s0 + $0x1f8] sm:$0xff] }
  0x18   :  { %v29_v2 = vld [vmem:[%s1312_s0 + $0x78] sm:$0xff] }
  0x19   :  { %655 = vmatmul.msk.f32.gmra.mxu2 %vm86_vm0, %v48_v12  ;;  %671 = vmatmul.msk.f32.gmra.mxu3 %vm86_vm0, %v64_v13  ;;  %v45_v3 = vld [vmem:[%s1312_s0 + $0xf8] sm:$0xff] }
  0x1b   :  { %623 = vmatmul.msk.f32.gmra.mxu0 %vm86_vm0, %v16_v14  ;;  %639 = vmatmul.msk.f32.gmra.mxu1 %vm86_vm0, %v32_v15 }
  0x21   :  { %656 = vmatmul.msk.f32.gmra.mxu2 %vm86_vm0, %v49_v16  ;;  %672 = vmatmul.msk.f32.gmra.mxu3 %vm86_vm0, %v65_v17 }
  0x23   :  { %624 = vmatmul.msk.f32.gmra.mxu0 %vm86_vm0, %v17_v18  ;;  %640 = vmatmul.msk.f32.gmra.mxu1 %vm86_vm0, %v33_v19 }
  0x29   :  { %657 = vmatmul.msk.f32.gmra.mxu2 %vm86_vm0, %v50_v20  ;;  %673 = vmatmul.msk.f32.gmra.mxu3 %vm86_vm0, %v66_v21 }
  0x2b   :  { %625 = vmatmul.msk.f32.gmra.mxu0 %vm86_vm0, %v18_v22  ;;  %641 = vmatmul.msk.f32.gmra.mxu1 %vm86_vm0, %v34_v23 }
  0x31   :  { %658 = vmatmul.msk.f32.gmra.mxu2 %vm86_vm0, %v51_v24  ;;  %674 = vmatmul.msk.f32.gmra.mxu3 %vm86_vm0, %v67_v25 }
  0x33   :  { %626 = vmatmul.msk.f32.gmra.mxu0 %vm86_vm0, %v19_v26  ;;  %642 = vmatmul.msk.f32.gmra.mxu1 %vm86_vm0, %v35_v27 }
  0x39   :  { %659 = vmatmul.msk.f32.gmra.mxu2 %vm86_vm0, %v52_v28  ;;  %675 = vmatmul.msk.f32.gmra.mxu3 %vm86_vm0, %v68_v29 }
  0x3b   :  { %627 = vmatmul.msk.f32.gmra.mxu0 %vm86_vm0, %v20_v30  ;;  %643 = vmatmul.msk.f32.gmra.mxu1 %vm86_vm0, %v36_v31 }
  0x41   :  { %660 = vmatmul.msk.f32.gmra.mxu2 %vm86_vm0, %v53_v32  ;;  %676 = vmatmul.msk.f32.gmra.mxu3 %vm86_vm0, %v69_v33 }
  0x43   :  { %628 = vmatmul.msk.f32.gmra.mxu0 %vm86_vm0, %v21_v34  ;;  %644 = vmatmul.msk.f32.gmra.mxu1 %vm86_vm0, %v37_v35 }
  0x49   :  { %661 = vmatmul.msk.f32.gmra.mxu2 %vm86_vm0, %v54_v36  ;;  %677 = vmatmul.msk.f32.gmra.mxu3 %vm86_vm0, %v70_v37 }
  0x4b   :  { %629 = vmatmul.msk.f32.gmra.mxu0 %vm86_vm0, %v22_v38  ;;  %645 = vmatmul.msk.f32.gmra.mxu1 %vm86_vm0, %v38_v39 }
  0x51   :  { %662 = vmatmul.msk.f32.gmra.mxu2 %vm86_vm0, %v55_v40  ;;  %678 = vmatmul.msk.f32.gmra.mxu3 %vm86_vm0, %v71_v41 }
  0x53   :  { %630 = vmatmul.msk.f32.gmra.mxu0 %vm86_vm0, %v23_v42  ;;  %646 = vmatmul.msk.f32.gmra.mxu1 %vm86_vm0, %v39_v43 }
  0x59   :  { %663 = vmatmul.msk.f32.gmra.mxu2 %vm86_vm0, %v56_v44  ;;  %679 = vmatmul.msk.f32.gmra.mxu3 %vm86_vm0, %v72_v45 }
  0x5b   :  { %631 = vmatmul.msk.f32.gmra.mxu0 %vm86_vm0, %v24_v46  ;;  %647 = vmatmul.msk.f32.gmra.mxu1 %vm86_vm0, %v40_v47 }
  0x61   :  { %664 = vmatmul.msk.f32.gmra.mxu2 %vm86_vm0, %v57_v48  ;;  %680 = vmatmul.msk.f32.gmra.mxu3 %vm86_vm0, %v73_v49 }
  0x63   :  { %632 = vmatmul.msk.f32.gmra.mxu0 %vm86_vm0, %v25_v50  ;;  %648 = vmatmul.msk.f32.gmra.mxu1 %vm86_vm0, %v41_v51 }
  0x69   :  { %665 = vmatmul.msk.f32.gmra.mxu2 %vm86_vm0, %v58_v52  ;;  %681 = vmatmul.msk.f32.gmra.mxu3 %vm86_vm0, %v74_v53 }
  0x6b   :  { %633 = vmatmul.msk.f32.gmra.mxu0 %vm86_vm0, %v26_v54  ;;  %649 = vmatmul.msk.f32.gmra.mxu1 %vm86_vm0, %v42_v55 }
  0x71   :  { %666 = vmatmul.msk.f32.gmra.mxu2 %vm86_vm0, %v59_v56  ;;  %682 = vmatmul.msk.f32.gmra.mxu3 %vm86_vm0, %v75_v57 }
  0x73   :  { %634 = vmatmul.msk.f32.gmra.mxu0 %vm86_vm0, %v27_v58  ;;  %650 = vmatmul.msk.f32.gmra.mxu1 %vm86_vm0, %v43_v59 }
  0x79   :  { %667 = vmatmul.msk.f32.gmra.mxu2 %vm86_vm0, %v60_v60  ;;  %683 = vmatmul.msk.f32.gmra.mxu3 %vm86_vm0, %v76_v61 }
  0x7b   :  { %635 = vmatmul.msk.f32.gmra.mxu0 %vm86_vm0, %v28_v62  ;;  %651 = vmatmul.msk.f32.gmra.mxu1 %vm86_vm0, %v44_v63 }
  0x81   :  { %668 = vmatmul.msk.f32.gmra.mxu2 %vm86_vm0, %v61_v0  ;;  %684 = vmatmul.msk.f32.gmra.mxu3 %vm86_vm0, %v77_v1 }
  0x83   :  { %636 = vmatmul.msk.f32.gmra.mxu0 %vm86_vm0, %v29_v2  ;;  %652 = vmatmul.msk.f32.gmra.mxu1 %vm86_vm0, %v45_v3 }
  0x88   :  { %v296_v5 = vpop.f32.mrf.mxu0  ;;  %v344_v6 = vpop.f32.mrf.mxu1 }
  0x89   :  { %v297_v7 = vadd.f32 %v989_v4, %v296_v5  ;;  %v345_v8 = vadd.f32 %v989_v4, %v344_v6 }
  0x8b   :  { %v488_v9 = vmax.f32 %v297_v7, 0.0  ;;  %v504_v10 = vmax.f32 %v345_v8, 0.0 }
  0x8c   :  { %v392_v11 = vpop.f32.mrf.mxu2  ;;  %v440_v12 = vpop.f32.mrf.mxu3 }
  0x8d   :  { %553 = vst.msk [vmem:[%s1314_s3] sm:$0xff] %vm552_vm1, %v488_v9  ;;  %v393_v13 = vadd.f32 %v989_v4, %v392_v11  ;;  %v441_v14 = vadd.f32 %v989_v4, %v440_v12 }
  0x8e   :  { %569 = vst.msk [vmem:[%s1314_s3 + $0x80] sm:$0xff] %vm552_vm1, %v504_v10 }
  0x8f   :  { %v520_v15 = vmax.f32 %v393_v13, 0.0  ;;  %v536_v16 = vmax.f32 %v441_v14, 0.0 }
  0x90   :  { %v299_v17 = vpop.f32.mrf.mxu0  ;;  %v347_v18 = vpop.f32.mrf.mxu1 }
  0x91   :  { %585 = vst.msk [vmem:[%s1314_s3 + $0x100] sm:$0xff] %vm552_vm1, %v520_v15  ;;  %v300_v19 = vadd.f32 %v989_v4, %v299_v17  ;;  %v348_v20 = vadd.f32 %v989_v4, %v347_v18 }
  0x92   :  { %601 = vst.msk [vmem:[%s1314_s3 + $0x180] sm:$0xff] %vm552_vm1, %v536_v16 }
  0x93   :  { %v489_v21 = vmax.f32 %v300_v19, 0.0  ;;  %v505_v22 = vmax.f32 %v348_v20, 0.0 }
  0x94   :  { %v395_v23 = vpop.f32.mrf.mxu2  ;;  %v443_v24 = vpop.f32.mrf.mxu3 }
  0x95   :  { %554 = vst.msk [vmem:[%s1314_s3 + $0x8] sm:$0xff] %vm552_vm1, %v489_v21  ;;  %v396_v25 = vadd.f32 %v989_v4, %v395_v23  ;;  %v444_v26 = vadd.f32 %v989_v4, %v443_v24 }
  0x96   :  { %570 = vst.msk [vmem:[%s1314_s3 + $0x88] sm:$0xff] %vm552_vm1, %v505_v22 }
  0x97   :  { %v521_v27 = vmax.f32 %v396_v25, 0.0  ;;  %v537_v28 = vmax.f32 %v444_v26, 0.0 }
  0x98   :  { %v302_v29 = vpop.f32.mrf.mxu0  ;;  %v350_v30 = vpop.f32.mrf.mxu1 }
  0x99   :  { %586 = vst.msk [vmem:[%s1314_s3 + $0x108] sm:$0xff] %vm552_vm1, %v521_v27  ;;  %v303_v31 = vadd.f32 %v989_v4, %v302_v29  ;;  %v351_v32 = vadd.f32 %v989_v4, %v350_v30 }
  0x9a   :  { %602 = vst.msk [vmem:[%s1314_s3 + $0x188] sm:$0xff] %vm552_vm1, %v537_v28 }
  0x9b   :  { %v490_v33 = vmax.f32 %v303_v31, 0.0  ;;  %v506_v34 = vmax.f32 %v351_v32, 0.0 }
  0x9c   :  { %v398_v35 = vpop.f32.mrf.mxu2  ;;  %v446_v36 = vpop.f32.mrf.mxu3 }
  0x9d   :  { %555 = vst.msk [vmem:[%s1314_s3 + $0x10] sm:$0xff] %vm552_vm1, %v490_v33  ;;  %v399_v37 = vadd.f32 %v989_v4, %v398_v35  ;;  %v447_v38 = vadd.f32 %v989_v4, %v446_v36 }
  0x9e   :  { %571 = vst.msk [vmem:[%s1314_s3 + $0x90] sm:$0xff] %vm552_vm1, %v506_v34 }
  0x9f   :  { %v522_v39 = vmax.f32 %v399_v37, 0.0  ;;  %v538_v40 = vmax.f32 %v447_v38, 0.0 }
  0xa0   :  { %v305_v41 = vpop.f32.mrf.mxu0  ;;  %v353_v42 = vpop.f32.mrf.mxu1 }
  0xa1   :  { %587 = vst.msk [vmem:[%s1314_s3 + $0x110] sm:$0xff] %vm552_vm1, %v522_v39  ;;  %v306_v43 = vadd.f32 %v989_v4, %v305_v41  ;;  %v354_v44 = vadd.f32 %v989_v4, %v353_v42 }
  0xa2   :  { %603 = vst.msk [vmem:[%s1314_s3 + $0x190] sm:$0xff] %vm552_vm1, %v538_v40 }
  0xa3   :  { %v491_v45 = vmax.f32 %v306_v43, 0.0  ;;  %v507_v46 = vmax.f32 %v354_v44, 0.0 }
  0xa4   :  { %v401_v47 = vpop.f32.mrf.mxu2  ;;  %v449_v48 = vpop.f32.mrf.mxu3 }
  0xa5   :  { %556 = vst.msk [vmem:[%s1314_s3 + $0x18] sm:$0xff] %vm552_vm1, %v491_v45  ;;  %v402_v49 = vadd.f32 %v989_v4, %v401_v47  ;;  %v450_v50 = vadd.f32 %v989_v4, %v449_v48 }
  0xa6   :  { %572 = vst.msk [vmem:[%s1314_s3 + $0x98] sm:$0xff] %vm552_vm1, %v507_v46 }
  0xa7   :  { %v523_v51 = vmax.f32 %v402_v49, 0.0  ;;  %v539_v52 = vmax.f32 %v450_v50, 0.0 }
  0xa8   :  { %v308_v53 = vpop.f32.mrf.mxu0  ;;  %v356_v54 = vpop.f32.mrf.mxu1 }
  0xa9   :  { %588 = vst.msk [vmem:[%s1314_s3 + $0x118] sm:$0xff] %vm552_vm1, %v523_v51  ;;  %v309_v55 = vadd.f32 %v989_v4, %v308_v53  ;;  %v357_v56 = vadd.f32 %v989_v4, %v356_v54 }
  0xaa   :  { %604 = vst.msk [vmem:[%s1314_s3 + $0x198] sm:$0xff] %vm552_vm1, %v539_v52 }
  0xab   :  { %v492_v57 = vmax.f32 %v309_v55, 0.0  ;;  %v508_v58 = vmax.f32 %v357_v56, 0.0 }
  0xac   :  { %v404_v59 = vpop.f32.mrf.mxu2  ;;  %v452_v60 = vpop.f32.mrf.mxu3 }
  0xad   :  { %557 = vst.msk [vmem:[%s1314_s3 + $0x20] sm:$0xff] %vm552_vm1, %v492_v57  ;;  %v405_v61 = vadd.f32 %v989_v4, %v404_v59  ;;  %v453_v62 = vadd.f32 %v989_v4, %v452_v60 }
  0xae   :  { %573 = vst.msk [vmem:[%s1314_s3 + $0xa0] sm:$0xff] %vm552_vm1, %v508_v58 }
  0xaf   :  { %v524_v63 = vmax.f32 %v405_v61, 0.0  ;;  %v540_v0 = vmax.f32 %v453_v62, 0.0 }
  0xb0   :  { %v311_v1 = vpop.f32.mrf.mxu0  ;;  %v359_v2 = vpop.f32.mrf.mxu1 }
  0xb1   :  { %589 = vst.msk [vmem:[%s1314_s3 + $0x120] sm:$0xff] %vm552_vm1, %v524_v63  ;;  %v312_v3 = vadd.f32 %v989_v4, %v311_v1  ;;  %v360_v5 = vadd.f32 %v989_v4, %v359_v2 }
  0xb2   :  { %605 = vst.msk [vmem:[%s1314_s3 + $0x1a0] sm:$0xff] %vm552_vm1, %v540_v0 }
  0xb3   :  { %v493_v6 = vmax.f32 %v312_v3, 0.0  ;;  %v509_v7 = vmax.f32 %v360_v5, 0.0 }
  0xb4   :  { %v407_v8 = vpop.f32.mrf.mxu2  ;;  %v455_v9 = vpop.f32.mrf.mxu3 }
  0xb5   :  { %558 = vst.msk [vmem:[%s1314_s3 + $0x28] sm:$0xff] %vm552_vm1, %v493_v6  ;;  %v408_v10 = vadd.f32 %v989_v4, %v407_v8  ;;  %v456_v11 = vadd.f32 %v989_v4, %v455_v9 }
  0xb6   :  { %574 = vst.msk [vmem:[%s1314_s3 + $0xa8] sm:$0xff] %vm552_vm1, %v509_v7 }
  0xb7   :  { %v525_v12 = vmax.f32 %v408_v10, 0.0  ;;  %v541_v13 = vmax.f32 %v456_v11, 0.0 }
  0xb8   :  { %v314_v14 = vpop.f32.mrf.mxu0  ;;  %v362_v15 = vpop.f32.mrf.mxu1 }
  0xb9   :  { %590 = vst.msk [vmem:[%s1314_s3 + $0x128] sm:$0xff] %vm552_vm1, %v525_v12  ;;  %v315_v16 = vadd.f32 %v989_v4, %v314_v14  ;;  %v363_v17 = vadd.f32 %v989_v4, %v362_v15 }
  0xba   :  { %606 = vst.msk [vmem:[%s1314_s3 + $0x1a8] sm:$0xff] %vm552_vm1, %v541_v13 }
  0xbb   :  { %v494_v18 = vmax.f32 %v315_v16, 0.0  ;;  %v510_v19 = vmax.f32 %v363_v17, 0.0 }
  0xbc   :  { %v410_v20 = vpop.f32.mrf.mxu2  ;;  %v458_v21 = vpop.f32.mrf.mxu3 }
  0xbd   :  { %559 = vst.msk [vmem:[%s1314_s3 + $0x30] sm:$0xff] %vm552_vm1, %v494_v18  ;;  %v411_v22 = vadd.f32 %v989_v4, %v410_v20  ;;  %v459_v23 = vadd.f32 %v989_v4, %v458_v21 }
  0xbe   :  { %575 = vst.msk [vmem:[%s1314_s3 + $0xb0] sm:$0xff] %vm552_vm1, %v510_v19 }
  0xbf   :  { %v526_v24 = vmax.f32 %v411_v22, 0.0  ;;  %v542_v25 = vmax.f32 %v459_v23, 0.0 }
  0xc0   :  { %v317_v26 = vpop.f32.mrf.mxu0  ;;  %v365_v27 = vpop.f32.mrf.mxu1 }
  0xc1   :  { %591 = vst.msk [vmem:[%s1314_s3 + $0x130] sm:$0xff] %vm552_vm1, %v526_v24  ;;  %v318_v28 = vadd.f32 %v989_v4, %v317_v26  ;;  %v366_v29 = vadd.f32 %v989_v4, %v365_v27 }
  0xc2   :  { %607 = vst.msk [vmem:[%s1314_s3 + $0x1b0] sm:$0xff] %vm552_vm1, %v542_v25 }
  0xc3   :  { %v495_v30 = vmax.f32 %v318_v28, 0.0  ;;  %v511_v31 = vmax.f32 %v366_v29, 0.0 }
  0xc4   :  { %v413_v32 = vpop.f32.mrf.mxu2  ;;  %v461_v33 = vpop.f32.mrf.mxu3 }
  0xc5   :  { %560 = vst.msk [vmem:[%s1314_s3 + $0x38] sm:$0xff] %vm552_vm1, %v495_v30  ;;  %v414_v34 = vadd.f32 %v989_v4, %v413_v32  ;;  %v462_v35 = vadd.f32 %v989_v4, %v461_v33 }
  0xc6   :  { %576 = vst.msk [vmem:[%s1314_s3 + $0xb8] sm:$0xff] %vm552_vm1, %v511_v31 }
  0xc7   :  { %v527_v36 = vmax.f32 %v414_v34, 0.0  ;;  %v543_v37 = vmax.f32 %v462_v35, 0.0 }
  0xc8   :  { %v320_v38 = vpop.f32.mrf.mxu0  ;;  %v368_v39 = vpop.f32.mrf.mxu1 }
  0xc9   :  { %592 = vst.msk [vmem:[%s1314_s3 + $0x138] sm:$0xff] %vm552_vm1, %v527_v36  ;;  %v321_v40 = vadd.f32 %v989_v4, %v320_v38  ;;  %v369_v41 = vadd.f32 %v989_v4, %v368_v39 }
  0xca   :  { %608 = vst.msk [vmem:[%s1314_s3 + $0x1b8] sm:$0xff] %vm552_vm1, %v543_v37 }
  0xcb   :  { %v496_v42 = vmax.f32 %v321_v40, 0.0  ;;  %v512_v43 = vmax.f32 %v369_v41, 0.0 }
  0xcc   :  { %v416_v44 = vpop.f32.mrf.mxu2  ;;  %v464_v45 = vpop.f32.mrf.mxu3 }
  0xcd   :  { %561 = vst.msk [vmem:[%s1314_s3 + $0x40] sm:$0xff] %vm552_vm1, %v496_v42  ;;  %v417_v46 = vadd.f32 %v989_v4, %v416_v44  ;;  %v465_v47 = vadd.f32 %v989_v4, %v464_v45 }
  0xce   :  { %577 = vst.msk [vmem:[%s1314_s3 + $0xc0] sm:$0xff] %vm552_vm1, %v512_v43 }
  0xcf   :  { %v528_v48 = vmax.f32 %v417_v46, 0.0  ;;  %v544_v49 = vmax.f32 %v465_v47, 0.0 }
  0xd0   :  { %v323_v50 = vpop.f32.mrf.mxu0  ;;  %v371_v51 = vpop.f32.mrf.mxu1 }
  0xd1   :  { %593 = vst.msk [vmem:[%s1314_s3 + $0x140] sm:$0xff] %vm552_vm1, %v528_v48  ;;  %v324_v52 = vadd.f32 %v989_v4, %v323_v50  ;;  %v372_v53 = vadd.f32 %v989_v4, %v371_v51 }
  0xd2   :  { %609 = vst.msk [vmem:[%s1314_s3 + $0x1c0] sm:$0xff] %vm552_vm1, %v544_v49 }
  0xd3   :  { %v497_v54 = vmax.f32 %v324_v52, 0.0  ;;  %v513_v55 = vmax.f32 %v372_v53, 0.0 }
  0xd4   :  { %v419_v56 = vpop.f32.mrf.mxu2  ;;  %v467_v57 = vpop.f32.mrf.mxu3 }
  0xd5   :  { %562 = vst.msk [vmem:[%s1314_s3 + $0x48] sm:$0xff] %vm552_vm1, %v497_v54  ;;  %v420_v58 = vadd.f32 %v989_v4, %v419_v56  ;;  %v468_v59 = vadd.f32 %v989_v4, %v467_v57 }
  0xd6   :  { %578 = vst.msk [vmem:[%s1314_s3 + $0xc8] sm:$0xff] %vm552_vm1, %v513_v55 }
  0xd7   :  { %v529_v60 = vmax.f32 %v420_v58, 0.0  ;;  %v545_v61 = vmax.f32 %v468_v59, 0.0 }
  0xd8   :  { %v326_v62 = vpop.f32.mrf.mxu0  ;;  %v374_v63 = vpop.f32.mrf.mxu1 }
  0xd9   :  { %594 = vst.msk [vmem:[%s1314_s3 + $0x148] sm:$0xff] %vm552_vm1, %v529_v60  ;;  %v327_v0 = vadd.f32 %v989_v4, %v326_v62  ;;  %v375_v1 = vadd.f32 %v989_v4, %v374_v63 }
  0xda   :  { %610 = vst.msk [vmem:[%s1314_s3 + $0x1c8] sm:$0xff] %vm552_vm1, %v545_v61 }
  0xdb   :  { %v498_v2 = vmax.f32 %v327_v0, 0.0  ;;  %v514_v3 = vmax.f32 %v375_v1, 0.0 }
  0xdc   :  { %v422_v5 = vpop.f32.mrf.mxu2  ;;  %v470_v6 = vpop.f32.mrf.mxu3 }
  0xdd   :  { %563 = vst.msk [vmem:[%s1314_s3 + $0x50] sm:$0xff] %vm552_vm1, %v498_v2  ;;  %v423_v7 = vadd.f32 %v989_v4, %v422_v5  ;;  %v471_v8 = vadd.f32 %v989_v4, %v470_v6 }
  0xde   :  { %579 = vst.msk [vmem:[%s1314_s3 + $0xd0] sm:$0xff] %vm552_vm1, %v514_v3 }
  0xdf   :  { %v530_v9 = vmax.f32 %v423_v7, 0.0  ;;  %v546_v10 = vmax.f32 %v471_v8, 0.0 }
  0xe0   :  { %v329_v11 = vpop.f32.mrf.mxu0  ;;  %v377_v12 = vpop.f32.mrf.mxu1 }
  0xe1   :  { %595 = vst.msk [vmem:[%s1314_s3 + $0x150] sm:$0xff] %vm552_vm1, %v530_v9  ;;  %v330_v13 = vadd.f32 %v989_v4, %v329_v11  ;;  %v378_v14 = vadd.f32 %v989_v4, %v377_v12 }
  0xe2   :  { %611 = vst.msk [vmem:[%s1314_s3 + $0x1d0] sm:$0xff] %vm552_vm1, %v546_v10 }
  0xe3   :  { %v499_v15 = vmax.f32 %v330_v13, 0.0  ;;  %v515_v16 = vmax.f32 %v378_v14, 0.0 }
  0xe4   :  { %v425_v17 = vpop.f32.mrf.mxu2  ;;  %v473_v18 = vpop.f32.mrf.mxu3 }
  0xe5   :  { %564 = vst.msk [vmem:[%s1314_s3 + $0x58] sm:$0xff] %vm552_vm1, %v499_v15  ;;  %v426_v19 = vadd.f32 %v989_v4, %v425_v17  ;;  %v474_v20 = vadd.f32 %v989_v4, %v473_v18 }
  0xe6   :  { %580 = vst.msk [vmem:[%s1314_s3 + $0xd8] sm:$0xff] %vm552_vm1, %v515_v16 }
  0xe7   :  { %v531_v21 = vmax.f32 %v426_v19, 0.0  ;;  %v547_v22 = vmax.f32 %v474_v20, 0.0 }
  0xe8   :  { %v332_v23 = vpop.f32.mrf.mxu0  ;;  %v380_v24 = vpop.f32.mrf.mxu1 }
  0xe9   :  { %596 = vst.msk [vmem:[%s1314_s3 + $0x158] sm:$0xff] %vm552_vm1, %v531_v21  ;;  %v333_v25 = vadd.f32 %v989_v4, %v332_v23  ;;  %v381_v26 = vadd.f32 %v989_v4, %v380_v24 }
  0xea   :  { %612 = vst.msk [vmem:[%s1314_s3 + $0x1d8] sm:$0xff] %vm552_vm1, %v547_v22 }
  0xeb   :  { %v500_v27 = vmax.f32 %v333_v25, 0.0  ;;  %v516_v28 = vmax.f32 %v381_v26, 0.0 }
  0xec   :  { %v428_v29 = vpop.f32.mrf.mxu2  ;;  %v476_v30 = vpop.f32.mrf.mxu3 }
  0xed   :  { %565 = vst.msk [vmem:[%s1314_s3 + $0x60] sm:$0xff] %vm552_vm1, %v500_v27  ;;  %v429_v31 = vadd.f32 %v989_v4, %v428_v29  ;;  %v477_v32 = vadd.f32 %v989_v4, %v476_v30 }
  0xee   :  { %581 = vst.msk [vmem:[%s1314_s3 + $0xe0] sm:$0xff] %vm552_vm1, %v516_v28 }
  0xef   :  { %v532_v33 = vmax.f32 %v429_v31, 0.0  ;;  %v548_v34 = vmax.f32 %v477_v32, 0.0 }
  0xf0   :  { %v335_v35 = vpop.f32.mrf.mxu0  ;;  %v383_v36 = vpop.f32.mrf.mxu1 }
  0xf1   :  { %597 = vst.msk [vmem:[%s1314_s3 + $0x160] sm:$0xff] %vm552_vm1, %v532_v33  ;;  %v336_v37 = vadd.f32 %v989_v4, %v335_v35  ;;  %v384_v38 = vadd.f32 %v989_v4, %v383_v36 }
  0xf2   :  { %613 = vst.msk [vmem:[%s1314_s3 + $0x1e0] sm:$0xff] %vm552_vm1, %v548_v34 }
  0xf3   :  { %v501_v39 = vmax.f32 %v336_v37, 0.0  ;;  %v517_v40 = vmax.f32 %v384_v38, 0.0 }
  0xf4   :  { %v431_v41 = vpop.f32.mrf.mxu2  ;;  %v479_v42 = vpop.f32.mrf.mxu3 }
  0xf5   :  { %566 = vst.msk [vmem:[%s1314_s3 + $0x68] sm:$0xff] %vm552_vm1, %v501_v39  ;;  %v432_v43 = vadd.f32 %v989_v4, %v431_v41  ;;  %v480_v44 = vadd.f32 %v989_v4, %v479_v42 }
  0xf6   :  { %582 = vst.msk [vmem:[%s1314_s3 + $0xe8] sm:$0xff] %vm552_vm1, %v517_v40 }
  0xf7   :  { %v533_v45 = vmax.f32 %v432_v43, 0.0  ;;  %v549_v46 = vmax.f32 %v480_v44, 0.0 }
  0xf8   :  { %v338_v47 = vpop.f32.mrf.mxu0  ;;  %v386_v48 = vpop.f32.mrf.mxu1 }
  0xf9   :  { %598 = vst.msk [vmem:[%s1314_s3 + $0x168] sm:$0xff] %vm552_vm1, %v533_v45  ;;  %v339_v49 = vadd.f32 %v989_v4, %v338_v47  ;;  %v387_v50 = vadd.f32 %v989_v4, %v386_v48 }
  0xfa   :  { %614 = vst.msk [vmem:[%s1314_s3 + $0x1e8] sm:$0xff] %vm552_vm1, %v549_v46 }
  0xfb   :  { %v502_v51 = vmax.f32 %v339_v49, 0.0  ;;  %v518_v52 = vmax.f32 %v387_v50, 0.0 }
  0xfc   :  { %v434_v53 = vpop.f32.mrf.mxu2  ;;  %v482_v54 = vpop.f32.mrf.mxu3 }
  0xfd   :  { %567 = vst.msk [vmem:[%s1314_s3 + $0x70] sm:$0xff] %vm552_vm1, %v502_v51  ;;  %v435_v55 = vadd.f32 %v989_v4, %v434_v53  ;;  %v483_v56 = vadd.f32 %v989_v4, %v482_v54 }
  0xfe   :  { %583 = vst.msk [vmem:[%s1314_s3 + $0xf0] sm:$0xff] %vm552_vm1, %v518_v52 }
  0xff   :  { %v534_v57 = vmax.f32 %v435_v55, 0.0  ;;  %v550_v58 = vmax.f32 %v483_v56, 0.0 }
 0x100   :  { %v341_v59 = vpop.f32.mrf.mxu0  ;;  %v389_v60 = vpop.f32.mrf.mxu1 }
 0x101   :  { %599 = vst.msk [vmem:[%s1314_s3 + $0x170] sm:$0xff] %vm552_vm1, %v534_v57  ;;  %v342_v61 = vadd.f32 %v989_v4, %v341_v59  ;;  %v390_v62 = vadd.f32 %v989_v4, %v389_v60 }
 0x102   :  { %615 = vst.msk [vmem:[%s1314_s3 + $0x1f0] sm:$0xff] %vm552_vm1, %v550_v58 }
 0x103   :  { %v503_v63 = vmax.f32 %v342_v61, 0.0  ;;  %v519_v0 = vmax.f32 %v390_v62, 0.0 }
 0x104   :  { %v437_v1 = vpop.f32.mrf.mxu2  ;;  %v485_v2 = vpop.f32.mrf.mxu3 }
 0x105   :  { %568 = vst.msk [vmem:[%s1314_s3 + $0x78] sm:$0xff] %vm552_vm1, %v503_v63  ;;  %v438_v3 = vadd.f32 %v989_v4, %v437_v1  ;;  %v486_v5 = vadd.f32 %v989_v4, %v485_v2 }
 0x106   :  { %584 = vst.msk [vmem:[%s1314_s3 + $0xf8] sm:$0xff] %vm552_vm1, %v519_v0 }
 0x107   :  { %v535_v6 = vmax.f32 %v438_v3, 0.0  ;;  %v551_v7 = vmax.f32 %v486_v5, 0.0 }
 0x109   :  { %600 = vst.msk [vmem:[%s1314_s3 + $0x178] sm:$0xff] %vm552_vm1, %v535_v6 }
 0x10a   :  { %616 = vst.msk [vmem:[%s1314_s3 + $0x1f8] sm:$0xff] %vm552_vm1, %v551_v7 }

</bundles_post_ra>
